<compile_context>
chip_gen: v7x
topology: tpu7x:2x2x1
jax: 0.10.0
libtpu: 0.0.40
codegen_flags: <defaults>
</compile_context>

<pallas_src>
import functools

import jax
import jax.numpy as jnp
from jax.experimental import pallas as pl
from jax.experimental.pallas import tpu as pltpu


def _round_up(x, m):
    return (x + m - 1) // m * m


def _tpu_vmem_bytes():
    try:
        return int(pltpu.get_tpu_info().vmem_capacity_bytes)
    except Exception:
        return 64 * 1024 * 1024            # conservative fallback (v7x per-TC)


def _chip_defaults():
    """(row tile, hidden tile, vmem_limit_bytes) per TPU generation."""
    vmem = _tpu_vmem_bytes()
    if vmem >= 96 * 1024 * 1024:           # v5e / v6e: 128 MiB VMEM per TC
        return 512, 1024, 100 * 1024 * 1024
    return 256, 512, 48 * 1024 * 1024      # v7x: 64 MiB per TC, leave headroom


# ---------------------------------------------------------------------------
# LayerNorm kernel
# ---------------------------------------------------------------------------
def _layer_norm_kernel(x_ref, g_ref, b_ref, o_ref, *, eps):
    x = x_ref[...].astype(jnp.float32)
    mu = jnp.mean(x, axis=-1, keepdims=True)
    xc = x - mu
    var = jnp.mean(xc * xc, axis=-1, keepdims=True)
    y = xc * jax.lax.rsqrt(var + eps) * g_ref[...] + b_ref[...]
    o_ref[...] = y.astype(o_ref.dtype)


def layer_norm(x2d, gamma, beta, *, eps=1e-5, tm=None):
    M, C = x2d.shape
    d_tm, _, vmem_limit = _chip_defaults()
    tm = d_tm if tm is None else tm
    tm = min(tm, _round_up(M, 8))
    Mp = _round_up(M, tm)
    xp = jnp.zeros((Mp, C), x2d.dtype).at[:M].set(x2d)
    out = pl.pallas_call(
        functools.partial(_layer_norm_kernel, eps=eps),
        out_shape=jax.ShapeDtypeStruct((Mp, C), x2d.dtype),
        grid_spec=pltpu.PrefetchScalarGridSpec(
            num_scalar_prefetch=0,
            grid=(Mp // tm,),
            in_specs=[
                pl.BlockSpec((tm, C), lambda i: (i, 0)),
                pl.BlockSpec((1, C), lambda i: (0, 0)),
                pl.BlockSpec((1, C), lambda i: (0, 0)),
            ],
            out_specs=pl.BlockSpec((tm, C), lambda i: (i, 0)),
        ),
        compiler_params=pltpu.CompilerParams(
            dimension_semantics=("parallel",),
            vmem_limit_bytes=vmem_limit),
    )(xp, gamma.reshape(1, C), beta.reshape(1, C))
    return out[:M]


# ---------------------------------------------------------------------------
# Multi-head attention kernel (one batch element per grid step)
# ---------------------------------------------------------------------------
def _mha_kernel(x_ref, wq_ref, wk_ref, wv_ref, wp_ref, bp_ref, o_ref, *,
                num_heads, scale, causal, mxu_dtype):
    x = x_ref[0]                                                   # (T, C) bf16
    T, C = x.shape
    hd = C // num_heads
    # QKV projections: bf16 MXU operands, f32 accumulation.
    q = jnp.dot(x, wq_ref[...], preferred_element_type=jnp.float32)
    k = jnp.dot(x, wk_ref[...], preferred_element_type=jnp.float32)
    v = jnp.dot(x, wv_ref[...], preferred_element_type=jnp.float32)
    q = q * scale            # fold scale into q once (not per-head (T,T) muls)
    wp = wp_ref[...]
    if causal:
        # Mask iotas hoisted out of the head loop (JAX does not CSE them).
        row = jax.lax.broadcasted_iota(jnp.int32, (T, T), 0)
        col = jax.lax.broadcasted_iota(jnp.int32, (T, T), 1)
        causal_mask = col <= row
    acc = jnp.zeros((T, C), jnp.float32)
    # TODO(synk): per-head loop leaves the 256-wide v6e/v7x MXU half idle when
    # head_dim <= 128, and full (T,T) scores live in VMEM; a head-batched
    # einsum + flash-style T tiling would fix both for long sequences.
    for h in range(num_heads):                     # static loop over heads
        sl = slice(h * hd, (h + 1) * hd)
        qh = q[:, sl].astype(mxu_dtype)
        kh = k[:, sl].astype(mxu_dtype)
        vh = v[:, sl].astype(mxu_dtype)
        s = jnp.einsum("td,sd->ts", qh, kh, preferred_element_type=jnp.float32)
        if causal:
            s = jnp.where(causal_mask, s, -jnp.inf)
        m = jnp.max(s, axis=-1, keepdims=True)
        p = jnp.exp(s - m)
        p = p * pl.reciprocal(jnp.sum(p, axis=-1, keepdims=True), approx=True)
        oh = jnp.dot(p.astype(mxu_dtype), vh, preferred_element_type=jnp.float32)
        # proj(concat(heads)) == sum_h head_h @ Wp[h*hd:(h+1)*hd, :]
        acc = acc + jnp.dot(oh.astype(mxu_dtype), wp[sl, :],
                            preferred_element_type=jnp.float32)
    # TODO(synk): attention / projection dropout omitted (eval-mode identity).
    o_ref[0] = (acc + bp_ref[...]).astype(o_ref.dtype)


def multi_head_attention(x, wq, wk, wv, wproj, bproj_row, *, num_heads,
                         causal=False, mxu_dtype=jnp.bfloat16):
    B, T, C = x.shape
    assert C % num_heads == 0
    scale = float(C) ** -0.5        # PyTorch Head scales by n_embd**-0.5
    _, _, vmem_limit = _chip_defaults()
    kernel = functools.partial(_mha_kernel, num_heads=num_heads, scale=scale,
                               causal=causal, mxu_dtype=mxu_dtype)
    return pl.pallas_call(
        kernel,
        out_shape=jax.ShapeDtypeStruct((B, T, C), jnp.float32),
        grid_spec=pltpu.PrefetchScalarGridSpec(
            num_scalar_prefetch=0,
            grid=(B,),
            in_specs=[
                pl.BlockSpec((1, T, C), lambda b: (b, 0, 0)),
                pl.BlockSpec((C, C), lambda b: (0, 0)),
                pl.BlockSpec((C, C), lambda b: (0, 0)),
                pl.BlockSpec((C, C), lambda b: (0, 0)),
                pl.BlockSpec((C, C), lambda b: (0, 0)),
                pl.BlockSpec((1, C), lambda b: (0, 0)),
            ],
            out_specs=pl.BlockSpec((1, T, C), lambda b: (b, 0, 0)),
        ),
        compiler_params=pltpu.CompilerParams(
            dimension_semantics=("parallel",),
            vmem_limit_bytes=vmem_limit),
    )(x.astype(mxu_dtype), wq, wk, wv, wproj, bproj_row)


# ---------------------------------------------------------------------------
# Fused SparseMoE expert FFN kernel (+ fused residual add)
#   grid = (row tiles, experts, hidden tiles); scalar-prefetched activity
#   flags skip experts with zero gate mass in a row tile; gate-weighted
#   partials accumulate into an f32 VMEM scratch, written once at finalize.
# ---------------------------------------------------------------------------
def _moe_ffn_kernel(act_ref, x_ref, gate_ref, w1_ref, b1_ref, w2_ref, b2_ref,
                    res_ref, o_ref, acc_ref, *, mxu_dtype):
    i = pl.program_id(0)
    e = pl.program_id(1)
    k = pl.program_id(2)

    @pl.when((e == 0) & (k == 0))
    def _init():
        acc_ref[...] = jnp.zeros_like(acc_ref)

    # Any token in this row tile routed to expert e?  Gates are exactly 0 off
    # the top-k, so skipping inactive experts is exact.
    active = act_ref[i, e] > 0

    @pl.when(active)
    def _compute():
        gate = gate_ref[0]                                       # (tm, 1) f32
        # First linear (this hidden slice) + bias + ReLU.  MXU operands bf16,
        # bias/ReLU/gating/accumulation f32 (v5e VPU has no bf16 elementwise).
        h = jnp.dot(x_ref[...], w1_ref[0], preferred_element_type=jnp.float32)
        h = jnp.maximum(h + b1_ref[0], 0.0)
        # Gate folded into the (tm, th) activations (cheaper than a (tm, Cp)
        # f32 multiply per step) before the partial second matmul.
        hg = (gate * h).astype(mxu_dtype)
        acc_ref[...] += jnp.dot(hg, w2_ref[0],
                                preferred_element_type=jnp.float32)

    @pl.when(active & (k == 0))
    def _bias2():
        acc_ref[...] += gate_ref[0] * b2_ref[0]

    # TODO(synk): expert-internal dropout omitted (eval-mode identity).

    @pl.when((e == pl.num_programs(1) - 1) & (k == pl.num_programs(2) - 1))
    def _finalize():
        # Fused residual: block output is ln2(x) + MoE(ln2(x)).
        o_ref[...] = (acc_ref[...] + res_ref[...]).astype(o_ref.dtype)


def moe_ffn(x2d, gates, w1p, b1p, w2p, b2p, *, residual=None, tm=None, th=None,
            vmem_limit_bytes=None, mxu_dtype=jnp.bfloat16):
    """residual + sum_e gates[:,e]*(relu(x @ w1[e] + b1[e]) @ w2[e] + b2[e]).

    w1p/b1p/w2p/b2p are the pre-padded / bf16-cast expert weights produced
    once by prepare_block_params (padding hoisted out of the per-call path)."""
    M, C = x2d.shape
    E, Cp, Hp = w1p.shape
    d_tm, d_th, d_vmem = _chip_defaults()
    tm = d_tm if tm is None else tm
    th = d_th if th is None else th
    vmem_limit_bytes = d_vmem if vmem_limit_bytes is None else vmem_limit_bytes

    tm = min(tm, _round_up(M, 8))
    Mp = _round_up(M, tm)
    th = min(th, Hp)
    while Hp % th:                 # largest 128-multiple tile that divides Hp
        th -= 128

    # Per-call activation padding (zero padding is exact for this computation).
    xp = jnp.zeros((Mp, Cp), mxu_dtype).at[:M, :C].set(x2d.astype(mxu_dtype))
    res = jnp.zeros((M, C), jnp.float32) if residual is None else residual
    resp = jnp.zeros((Mp, Cp), jnp.float32).at[:M, :C].set(res.astype(jnp.float32))
    gates_p = jnp.zeros((Mp, E), jnp.float32).at[:M].set(gates.astype(jnp.float32))
    gp = gates_p.T.reshape(E, Mp, 1)

    n_row_tiles = Mp // tm
    # Per-(row tile, expert) activity flags, scalar-prefetched into SMEM.
    active = (gates_p.reshape(n_row_tiles, tm, E) > 0).any(axis=1).astype(jnp.int32)

    grid = (n_row_tiles, E, Hp // th)
    isz = jnp.dtype(mxu_dtype).itemsize
    cost = pl.CostEstimate(
        flops=2 * Mp * E * (Cp * Hp + Hp * Cp),
        transcendentals=0,
        bytes_accessed=(Mp * Cp * isz                                  # x
                        + n_row_tiles * E * (Cp * Hp + Hp * Cp) * isz  # W1/W2 per row tile
                        + E * Mp * 4                                   # gates
                        + n_row_tiles * E * (Hp + Cp) * 4              # biases
                        + 2 * Mp * Cp * 4),                            # residual + output
    )

    out = pl.pallas_call(
        functools.partial(_moe_ffn_kernel, mxu_dtype=mxu_dtype),
        out_shape=jax.ShapeDtypeStruct((Mp, Cp), jnp.float32),
        grid_spec=pltpu.PrefetchScalarGridSpec(
            num_scalar_prefetch=1,                     # activity flags (SMEM)
            grid=grid,
            in_specs=[
                pl.BlockSpec((tm, Cp), lambda i, e, k, act: (i, 0)),        # x rows
                pl.BlockSpec((1, tm, 1), lambda i, e, k, act: (e, i, 0)),   # gates
                pl.BlockSpec((1, Cp, th), lambda i, e, k, act: (e, 0, k)),  # W1 cols
                pl.BlockSpec((1, 1, th), lambda i, e, k, act: (e, 0, k)),   # b1
                pl.BlockSpec((1, th, Cp), lambda i, e, k, act: (e, k, 0)),  # W2 rows
                pl.BlockSpec((1, 1, Cp), lambda i, e, k, act: (e, 0, 0)),   # b2
                pl.BlockSpec((tm, Cp), lambda i, e, k, act: (i, 0)),        # residual
            ],
            out_specs=pl.BlockSpec((tm, Cp), lambda i, e, k, act: (i, 0)),
            scratch_shapes=[pltpu.VMEM((tm, Cp), jnp.float32)],
        ),
        compiler_params=pltpu.CompilerParams(
            # Row axis is independent (megacore-parallel); expert and hidden
            # axes feed the resident accumulator, so they stay "arbitrary".
            dimension_semantics=("parallel", "arbitrary", "arbitrary"),
            vmem_limit_bytes=vmem_limit_bytes,
        ),
        cost_estimate=cost,
    )(active, xp, gp, w1p, b1p, w2p, b2p, resp)
    # TODO(synk): a production version would replace this flagged dense expert
    # sweep with megablox-style token grouping (sort tokens by expert, prefetch
    # per-expert row offsets) so inactive experts' weights are never DMA'd.
    return out[:M, :C]


# ---------------------------------------------------------------------------
# One-time parameter preparation (padding / bf16 casts hoisted out of wrappers)
# ---------------------------------------------------------------------------
def prepare_block_params(params, mxu_dtype=jnp.bfloat16):
    C = params["wq"].shape[0]
    E, _, H = params["w1"].shape
    Cp = _round_up(max(C, 128), 128)
    Hp = _round_up(H, 128)
    f32 = jnp.float32
    return dict(
        ln1_g=params["ln1_g"], ln1_b=params["ln1_b"],
        ln2_g=params["ln2_g"], ln2_b=params["ln2_b"],
        wq=params["wq"].astype(mxu_dtype), wk=params["wk"].astype(mxu_dtype),
        wv=params["wv"].astype(mxu_dtype), wproj=params["wproj"].astype(mxu_dtype),
        bproj=params["bproj"].reshape(1, C).astype(f32),
        wr=params["wr"], br=params["br"], wn=params["wn"], bn=params["bn"],
        w1=jnp.zeros((E, Cp, Hp), mxu_dtype).at[:, :C, :H].set(params["w1"].astype(mxu_dtype)),
        b1=jnp.zeros((E, 1, Hp), f32).at[:, 0, :H].set(params["b1"].astype(f32)),
        w2=jnp.zeros((E, Hp, Cp), mxu_dtype).at[:, :H, :C].set(params["w2"].astype(mxu_dtype)),
        b2=jnp.zeros((E, 1, Cp), f32).at[:, 0, :C].set(params["b2"].astype(f32)),
    )


# ---------------------------------------------------------------------------
# Router (plain JAX) and full block forward
# ---------------------------------------------------------------------------
def noisy_topk_router(x2d, wr, br, wn, bn, top_k, noise_key):
    # TODO(synk): top-k selection, scatter and Gaussian noise sampling have no
    # clean Pallas TPU equivalent; done with jax.lax.top_k / jax.random here.
    logits = x2d @ wr + br
    noise_logits = x2d @ wn + bn
    noise = jax.random.normal(noise_key, logits.shape, logits.dtype)
    noisy = logits + noise * jax.nn.softplus(noise_logits)
    top_vals, top_idx = jax.lax.top_k(noisy, top_k)
    sparse = jnp.full_like(noisy, -jnp.inf)
    rows = jnp.arange(noisy.shape[0])[:, None]
    sparse = sparse.at[rows, top_idx].set(top_vals)
    gates = jax.nn.softmax(sparse, axis=-1)     # exactly 0 off the top-k
    return gates, top_idx


def sparse_moe_block_forward(x, prep, noise_key, *, num_heads, top_k,
                             causal=False):
    B, T, C = x.shape
    xf = x.reshape(B * T, C)

    h1 = layer_norm(xf, prep["ln1_g"], prep["ln1_b"])
    attn = multi_head_attention(h1.reshape(B, T, C), prep["wq"], prep["wk"],
                                prep["wv"], prep["wproj"], prep["bproj"],
                                num_heads=num_heads, causal=causal)
    r1 = x + attn                                               # residual 1
    h2 = layer_norm(r1.reshape(B * T, C), prep["ln2_g"], prep["ln2_b"])
    gates, _ = noisy_topk_router(h2, prep["wr"], prep["br"],
                                 prep["wn"], prep["bn"], top_k, noise_key)
    # The PyTorch block adds the MoE output to the *post-ln2* activations;
    # that residual add is fused into the MoE kernel's finalize.
    out2d = moe_ffn(h2, gates, prep["w1"], prep["b1"], prep["w2"], prep["b2"],
                    residual=h2)
    out = out2d.reshape(B, T, C)
    aux = dict(h1=h1, attn=attn, h2=h2, gates=gates)
    return out, aux


# ---------------------------------------------------------------------------
# Pure-JAX references (mirroring the kernels' dtype policy)
# ---------------------------------------------------------------------------
def layer_norm_reference(x2d, g, b, eps=1e-5):
    mu = x2d.mean(axis=-1, keepdims=True)
    var = ((x2d - mu) ** 2).mean(axis=-1, keepdims=True)
    return (x2d - mu) * jax.lax.rsqrt(var + eps) * g + b


def mha_reference(x, wq, wk, wv, wproj, bproj, num_heads, causal=False,
                  mxu_dtype=jnp.bfloat16):
    B, T, C = x.shape
    hd = C // num_heads
    scale = float(C) ** -0.5
    f32 = jnp.float32
    xm = x.astype(mxu_dtype)
    q = jnp.einsum("btc,cd->btd", xm, wq.astype(mxu_dtype), preferred_element_type=f32) * scale
    k = jnp.einsum("btc,cd->btd", xm, wk.astype(mxu_dtype), preferred_element_type=f32)
    v = jnp.einsum("btc,cd->btd", xm, wv.astype(mxu_dtype), preferred_element_type=f32)
    wp = wproj.astype(mxu_dtype)
    acc = jnp.zeros((B, T, C), f32)
    for h in range(num_heads):
        sl = slice(h * hd, (h + 1) * hd)
        s = jnp.einsum("btd,bsd->bts", q[..., sl].astype(mxu_dtype),
                       k[..., sl].astype(mxu_dtype), preferred_element_type=f32)
        if causal:
            mask = jnp.tril(jnp.ones((T, T), bool))
            s = jnp.where(mask, s, -jnp.inf)
        p = jax.nn.softmax(s, axis=-1)
        oh = jnp.einsum("bts,bsd->btd", p.astype(mxu_dtype),
                        v[..., sl].astype(mxu_dtype), preferred_element_type=f32)
        acc = acc + jnp.einsum("btd,dc->btc", oh.astype(mxu_dtype), wp[sl, :],
                               preferred_element_type=f32)
    return acc + bproj


def moe_ffn_reference(x2d, gates, w1, b1, w2, b2, mxu_dtype=jnp.bfloat16):
    xm = x2d.astype(mxu_dtype)
    y = jnp.zeros(x2d.shape, jnp.float32)
    for e in range(w1.shape[0]):
        h = jnp.dot(xm, w1[e].astype(mxu_dtype),
                    preferred_element_type=jnp.float32)
        h = jnp.maximum(h + b1[e], 0.0)
        g = gates[:, e:e + 1].astype(jnp.float32)
        hg = (g * h).astype(mxu_dtype)
        ye = jnp.dot(hg, w2[e].astype(mxu_dtype),
                     preferred_element_type=jnp.float32)
        y = y + ye + g * b2[e]
    return y


# ---------------------------------------------------------------------------
if __name__ == "__main__":
    B, T, C = 2, 8, 32
    num_heads, num_experts, top_k = 4, 8, 2
    H = 4 * C

    keys = jax.random.split(jax.random.PRNGKey(0), 16)

    def unif(key, shape, fan_in):
        bound = 1.0 / (fan_in ** 0.5)
        return jax.random.uniform(key, shape, jnp.float32, -bound, bound)

    params = dict(
        ln1_g=jnp.ones((C,), jnp.float32), ln1_b=jnp.zeros((C,), jnp.float32),
        ln2_g=jnp.ones((C,), jnp.float32), ln2_b=jnp.zeros((C,), jnp.float32),
        wq=unif(keys[0], (C, C), C), wk=unif(keys[1], (C, C), C),
        wv=unif(keys[2], (C, C), C),
        wproj=unif(keys[3], (C, C), C), bproj=unif(keys[4], (C,), C),
        wr=unif(keys[5], (C, num_experts), C), br=unif(keys[6], (num_experts,), C),
        wn=unif(keys[7], (C, num_experts), C), bn=unif(keys[8], (num_experts,), C),
        w1=unif(keys[9], (num_experts, C, H), C),
        b1=unif(keys[10], (num_experts, H), C),
        w2=unif(keys[11], (num_experts, H, C), H),
        b2=unif(keys[12], (num_experts, C), H),
    )
    x = jax.random.normal(keys[13], (B, T, C), jnp.float32)
    noise_key = keys[14]

    prep = prepare_block_params(params)      # one-time padding / bf16 casts
    out, aux = sparse_moe_block_forward(x, prep, noise_key,
                                        num_heads=num_heads, top_k=top_k)
    jax.block_until_ready(out)

    # --- correctness checks against pure-JAX references ---------------------
    xf = x.reshape(B * T, C)
    h1_ref = layer_norm_reference(xf, params["ln1_g"], params["ln1_b"])
    attn_ref = mha_reference(h1_ref.reshape(B, T, C), params["wq"],
                             params["wk"], params["wv"], params["wproj"],
                             params["bproj"], num_heads)
    h2_ref = layer_norm_reference((x + attn_ref).reshape(B * T, C),
                                  params["ln2_g"], params["ln2_b"])
    # Reuse the kernel path's gates so a top-k tie flip caused by <1e-5 numeric
    # drift between the two paths cannot make the check flaky.
    moe_ref = moe_ffn_reference(h2_ref, aux["gates"], params["w1"],
                                params["b1"], params["w2"], params["b2"])
    out_ref = (h2_ref + moe_ref).reshape(B, T, C)
    moe_kernel = out.reshape(B * T, C) - aux["h2"]   # residual fused in-kernel

    assert jnp.allclose(aux["h1"], h1_ref, atol=2e-3, rtol=2e-3), "ln1 mismatch"
    assert jnp.allclose(aux["attn"], attn_ref, atol=2e-3, rtol=2e-3), "attn mismatch"
    assert jnp.allclose(aux["h2"], h2_ref, atol=2e-3, rtol=2e-3), "ln2 mismatch"
    assert jnp.allclose(moe_kernel, moe_ref, atol=2e-3, rtol=2e-3), "moe mismatch"
    assert jnp.allclose(out, out_ref, atol=2e-3, rtol=2e-3), "block output mismatch"

    print("KERNEL_OK")
</pallas_src>

<mosaic_0001>
module attributes {stable_mosaic.version = 11 : i64} {
  func.func @_layer_norm_kernel(%arg0: i32, %arg1: memref<16x32xf32, #tpu.memory_space<vmem>>, %arg2: memref<1x32xf32, #tpu.memory_space<vmem>>, %arg3: memref<1x32xf32, #tpu.memory_space<vmem>>, %arg4: memref<16x32xf32, #tpu.memory_space<vmem>>) attributes {dimension_semantics = [#tpu.dimension_semantics<parallel>], iteration_bounds = array<i64: 1>, scalar_prefetch = 0 : i64, scratch_operands = 0 : i64, tpu.core_type = #tpu.core_type<tc>, window_params = [{transform_indices = @transform_0, window_bounds = array<i64: 16, 32>}, {pipeline_mode = #tpu.pipeline_mode<synchronous>, transform_indices = @transform_1, window_bounds = array<i64: 1, 32>}, {pipeline_mode = #tpu.pipeline_mode<synchronous>, transform_indices = @transform_2, window_bounds = array<i64: 1, 32>}, {transform_indices = @transform_3, window_bounds = array<i64: 16, 32>}]} {
    %c0 = arith.constant 0 : index
    %c0_0 = arith.constant 0 : index
    %0 = vector.load %arg1[%c0, %c0_0] : memref<16x32xf32, #tpu.memory_space<vmem>>, vector<16x32xf32>
    %cst = arith.constant dense<0.000000e+00> : vector<16xf32>
    %1 = vector.multi_reduction <add>, %0, %cst [1] : vector<16x32xf32> to vector<16xf32>
    %2 = vector.shape_cast %1 : vector<16xf32> to vector<16x1xf32>
    %cst_1 = arith.constant 3.200000e+01 : f32
    %3 = vector.broadcast %cst_1 : f32 to vector<16x1xf32>
    %4 = arith.divf %2, %3 : vector<16x1xf32>
    %5 = vector.broadcast %4 : vector<16x1xf32> to vector<16x32xf32>
    %6 = arith.subf %0, %5 : vector<16x32xf32>
    %7 = arith.mulf %6, %6 : vector<16x32xf32>
    %cst_2 = arith.constant dense<0.000000e+00> : vector<16xf32>
    %8 = vector.multi_reduction <add>, %7, %cst_2 [1] : vector<16x32xf32> to vector<16xf32>
    %9 = vector.shape_cast %8 : vector<16xf32> to vector<16x1xf32>
    %cst_3 = arith.constant 3.200000e+01 : f32
    %10 = vector.broadcast %cst_3 : f32 to vector<16x1xf32>
    %11 = arith.divf %9, %10 : vector<16x1xf32>
    %cst_4 = arith.constant 9.99999974E-6 : f32
    %12 = vector.broadcast %cst_4 : f32 to vector<16x1xf32>
    %13 = arith.addf %11, %12 : vector<16x1xf32>
    %14 = math.rsqrt %13 : vector<16x1xf32>
    %15 = vector.broadcast %14 : vector<16x1xf32> to vector<16x32xf32>
    %16 = arith.mulf %6, %15 : vector<16x32xf32>
    %c0_5 = arith.constant 0 : index
    %c0_6 = arith.constant 0 : index
    %17 = vector.load %arg2[%c0_5, %c0_6] : memref<1x32xf32, #tpu.memory_space<vmem>>, vector<1x32xf32>
    %18 = vector.broadcast %17 : vector<1x32xf32> to vector<16x32xf32>
    %19 = arith.mulf %16, %18 : vector<16x32xf32>
    %c0_7 = arith.constant 0 : index
    %c0_8 = arith.constant 0 : index
    %20 = vector.load %arg3[%c0_7, %c0_8] : memref<1x32xf32, #tpu.memory_space<vmem>>, vector<1x32xf32>
    %21 = vector.broadcast %20 : vector<1x32xf32> to vector<16x32xf32>
    %22 = arith.addf %19, %21 : vector<16x32xf32>
    %c0_9 = arith.constant 0 : index
    %c0_10 = arith.constant 0 : index
    %23 = vector.load %arg4[%c0_9, %c0_10] : memref<16x32xf32, #tpu.memory_space<vmem>>, vector<16x32xf32>
    tpu.vector_store %arg4[%c0_9, %c0_10], %22 {strides = array<i32>} : memref<16x32xf32, #tpu.memory_space<vmem>>, vector<16x32xf32>,
    return
  }
  func.func @transform_0(%arg0: i32) -> (i32, i32) {
    %c0_i32 = arith.constant 0 : i32
    %c0_i32_0 = arith.constant 0 : i32
    return %arg0, %c0_i32 : i32, i32
  }
  func.func @transform_1(%arg0: i32) -> (i32, i32) {
    %c0_i32 = arith.constant 0 : i32
    %c0_i32_0 = arith.constant 0 : i32
    %c0_i32_1 = arith.constant 0 : i32
    return %c0_i32, %c0_i32_0 : i32, i32
  }
  func.func @transform_2(%arg0: i32) -> (i32, i32) {
    %c0_i32 = arith.constant 0 : i32
    %c0_i32_0 = arith.constant 0 : i32
    %c0_i32_1 = arith.constant 0 : i32
    return %c0_i32, %c0_i32_0 : i32, i32
  }
  func.func @transform_3(%arg0: i32) -> (i32, i32) {
    %c0_i32 = arith.constant 0 : i32
    %c0_i32_0 = arith.constant 0 : i32
    return %arg0, %c0_i32 : i32, i32
  }
}

</mosaic_0001>

<bundles_post_ra>
// kernel: tpu_custom_call.1
= control target key start
LH: loop header
LB: loop body
LE: loop exit
PB: predicated region body
PF: predicated region fallthrough
CT: control target
= control target key end

     0   :  { %8 = vsyncpa [#allocation3], 0  ;;  %s220_s0 = inlined_call_operand.hbm [shape: f32[16,32], index: 0, kind: input, shape index: {}]   ;;  %s221_s1 = inlined_call_operand.vmem [shape: f32[1,32], index: 1, kind: input, shape index: {}]   ;;  %s222_s2 = inlined_call_operand.vmem [shape: f32[1,32], index: 2, kind: input, shape index: {}]   ;;  %s223_s3 = inlined_call_operand.hbm [shape: f32[16,32], index: 3, kind: output, shape index: {}]  }
   0x1   :  { %9 = vsyncpa [#allocation4], 0  ;;  %s154_s12 = smov [#allocation2]   ;;  %s106_s16 = scalar_lea.hbm %s220_s0, 256 }
   0x2   :  { %s15_s13 = sshll.u32 %s154_s12, 4  ;;  %p107_p0 = scmp.ne.s32.totalorder %s220_s0, %s106_s16  ;;  %s16_s13 = int_to_ptr.vmem [resolvable:$true] %s15_s13 }
   0x3   :  { %p110_p1 = scmp.lt.u32.totalorder %s106_s16, %s220_s0 }
   0x5   :  { %p112_p2 = pnand %p110_p1, %p107_p0 }
   0x7   :  { %115 = shalt.err (!%p112_p2)
}
   0x8   :  { %s116_s21 = scalar_lea.vmem %s16_s13, 256  ;;  %p121_p4 = scmp.lt.s32.totalorder %s16_s13, %s16_s13 }
   0x9   :  { %p117_p3 = scmp.ne.s32.totalorder %s16_s13, %s116_s21  ;;  %p122_p5 = scmp.lt.s32.totalorder %s116_s21, %s116_s21 }
   0xb   :  { %p123_p6 = por %p122_p5, %p121_p4 }
   0xd   :  { %p124_p7 = pnand %p123_p6, %p117_p3 }
   0xf   :  { %127 = shalt.err (!%p124_p7)
}
  0x10   :  { %s155_s22 = smov 128   ;;  %s156_s23 = smov 8  }
  0x11   :  { %21 = dma.hbm_to_vmem [thread:$0]  %s220_s0, 256, %s16_s13, [#allocation3], %s155_s22, %s155_s22, %s156_s23  }
  0x12   :  { %150 = dma.done.wait [#allocation3], 256  }
  0x13   :  { %151 = vsyncadd [#allocation3], 4294967040  ;;  %vm31_vm0 = vcmask 261120   ;;  %v29_v0 = vld [vmem:[#allocation2] sm:$0xff]  ;;  %v30_v1 = vld [vmem:[#allocation2 + $0x8] sm:$0xff]  ;;  %s157_s29 = smov [#allocation5]  }
  0x14   :  { %v32_v2 = vsel %vm31_vm0, %v29_v0, 0.0  ;;  %v35_v3 = vsel %vm31_vm0, %v30_v1, 0.0  ;;  %v96_v21 = vld [vmem:[%s221_s1] ss:$0 sm:$0xff]  ;;  %s84_s30 = sshll.u32 %s157_s29, 4  ;;  %s85_s30 = int_to_ptr.vmem [resolvable:$true] %s84_s30 }
  0x15   :  { %33 = vadd.xlane.f32.xlu0 %v32_v2  ;;  %v97_v23 = vld [vmem:[%s222_s2] ss:$0 sm:$0xff]  ;;  %s128_s4 = scalar_lea.vmem %s85_s30, 256  ;;  %p133_p9 = scmp.lt.s32.totalorder %s85_s30, %s85_s30 }
  0x16   :  { %p129_p8 = scmp.ne.s32.totalorder %s85_s30, %s128_s4  ;;  %p134_p10 = scmp.lt.s32.totalorder %s128_s4, %s128_s4 }
  0x18   :  { %p135_p11 = por %p134_p10, %p133_p9 }
  0x19   :  { %36 = vadd.xlane.f32.xlu0 %v35_v3 }
  0x1a   :  { %p136_p12 = pnand %p135_p11, %p129_p8 }
  0xa2   :  { %v34_v4 = vpop.xlane.xlu0 %33 }
  0xa3   :  { %v39_v5 = vmul.f32 0.03125, %v34_v4 }
  0xa5   :  { %v41_v6 = vsub.f32 %v29_v0, %v39_v5 }
  0xa6   :  { %v37_v7 = vpop.xlane.xlu0 %36 }
  0xa7   :  { %v40_v8 = vmul.f32 0.03125, %v37_v7  ;;  %v43_v9 = vmul.f32 %v41_v6, %v41_v6 }
  0xa9   :  { %v42_v10 = vsub.f32 %v30_v1, %v40_v8  ;;  %v45_v11 = vsel %vm31_vm0, %v43_v9, 0.0 }
  0xaa   :  { %46 = vadd.xlane.f32.xlu1 %v45_v11 }
  0xab   :  { %v44_v12 = vmul.f32 %v42_v10, %v42_v10 }
  0xad   :  { %v48_v13 = vsel %vm31_vm0, %v44_v12, 0.0 }
  0xae   :  { %49 = vadd.xlane.f32.xlu1 %v48_v13 }
 0x137   :  { %v47_v14 = vpop.xlane.xlu1 %46 }
 0x138   :  { %v51_v15 = vmul.f32 0.03125, %v47_v14 }
 0x13a   :  { %v53_v16 = vadd.f32 1e-05, %v51_v15 }
 0x13b   :  { %v50_v17 = vpop.xlane.xlu1 %49 }
 0x13c   :  { %102 = vrsqrt.f32 %v53_v16  ;;  %v52_v18 = vmul.f32 0.03125, %v50_v17 }
 0x13e   :  { %v54_v19 = vadd.f32 1e-05, %v52_v18 }
 0x140   :  { %104 = vrsqrt.f32 %v54_v19 }
 0x146   :  { %v103_v20 = vpop.eup %102 }
 0x147   :  { %v57_v22 = vmul.f32 %v103_v20, %v41_v6 }
 0x149   :  { %v66_v24 = vmul.f32 %v96_v21, %v57_v22 }
 0x14a   :  { %v105_v25 = vpop.eup %104 }
 0x14b   :  { %v58_v26 = vmul.f32 %v105_v25, %v42_v10  ;;  %v75_v27 = vadd.f32 %v97_v23, %v66_v24 }
 0x14d   :  { %v67_v28 = vmul.f32 %v96_v21, %v58_v26  ;;  %77 = vst.msk [vmem:[#allocation5] sm:$0xff] %vm31_vm0, %v75_v27 }
 0x14f   :  { %v76_v29 = vadd.f32 %v97_v23, %v67_v28 }
 0x151   :  { %78 = vst.msk [vmem:[#allocation5 + $0x8] sm:$0xff] %vm31_vm0, %v76_v29 }
 0x152   :  { %139 = shalt.err (!%p136_p12)
}
 0x153   :  { %s140_s5 = scalar_lea.hbm %s223_s3, 256 }
 0x154   :  { %p141_p13 = scmp.ne.s32.totalorder %s223_s3, %s140_s5  ;;  %p144_p0 = scmp.lt.u32.totalorder %s140_s5, %s223_s3 }
 0x156   :  { %p146_p1 = pnand %p144_p0, %p141_p13 }
 0x158   :  { %149 = shalt.err (!%p146_p1)
}
 0x159   :  { %90 = dma.vmem_to_hbm [thread:$0]  %s85_s30, 256, %s223_s3, [#allocation4], %s155_s22, %s155_s22, %s156_s23  }
 0x15a   :  { %152 = dma.done.wait [#allocation4], 256  }
 0x15b   :  { %153 = vsyncadd [#allocation4], 4294967040 }
 0x15c   :  { %94 = vsyncpa [#allocation3], 1 }
 0x15d   :  { %95 = vsyncpa [#allocation4], 1 }

</bundles_post_ra>
